<compile_context>
chip_gen: v5e
topology: v5e:2x2
jax: 0.10.0
libtpu: 0.0.40
codegen_flags: <defaults>
</compile_context>

<pallas_src>
import numpy as np
import jax
import jax.numpy as jnp
from jax.experimental import pallas as pl
from jax.experimental.pallas import tpu as pltpu

DIM = 10
ITERATIONS = 2


def _round_up(x, m):
    return ((x + m - 1) // m) * m


# Static row offsets inside the packed params buffer (8-row aligned segments).
R_WHX = 0                            # rows [0, DIM)         : [Wz.T|Wr.T|Wh.T|Uz.T|Ur.T]
R_UH = _round_up(R_WHX + DIM, 8)     # rows [R_UH, R_UH+DIM) : Uh.T
R_B = _round_up(R_UH + DIM, 8)       # row  R_B              : [bz+buz | br+bur | bh+buh]
R_MASK = _round_up(R_B + 1, 8)       # rows [R_MASK, R_MASK + ITERATIONS*N) : activity masks
P_COLS = 5 * DIM


def grnn_kernel(data_ref, params_ref, out_ref):
    N = data_ref.shape[0]
    D3 = 3 * DIM

    adj = data_ref[:, :N]                           # (N, N)   0/1 adjacency, f32
    h = data_ref[:, N:]                             # (N, DIM) h0 * mask_0 (pre-folded)
    whx = params_ref[R_WHX:R_WHX + DIM, :]          # (DIM, 5*DIM) fused projection slab
    uh = params_ref[R_UH:R_UH + DIM, :DIM]          # (DIM, DIM)   Uh.T
    b = params_ref[R_B:R_B + 1, :D3]                # (1, 3*DIM)   pre-summed biases

    # ITERATIONS is a tiny static constant -> unroll in python.
    for i in range(ITERATIONS):
        last = i == ITERATIONS - 1
        if i > 0 or last:
            mask = params_ref[R_MASK + i * N:R_MASK + (i + 1) * N, :DIM]   # (N, DIM)
        # sender/h_i mask; at i == 0 it is already folded into h0 by the wrapper.
        hm = h * mask if i > 0 else h

        # One wide MXU push for all five projections of hm, then reassociated
        # neighbor aggregation: (adj @ hm) @ Wx == adj @ (hm @ Wx).
        q = jnp.dot(hm, whx, preferred_element_type=jnp.float32)            # (N, 5*DIM)
        gx = jnp.dot(adj, q[:, :D3], preferred_element_type=jnp.float32) + b
        gh = q[:, D3:]                                                       # (N, 2*DIM)

        z = jax.nn.sigmoid(gx[:, :DIM] + gh[:, :DIM])
        r = jax.nn.sigmoid(gx[:, DIM:2 * DIM] + gh[:, DIM:])
        h_tilde = jnp.tanh(
            gx[:, 2 * DIM:]
            + jnp.dot(r * hm, uh, preferred_element_type=jnp.float32))
        h = z * hm + (1.0 - z) * h_tilde

        if last:
            # Receiver-side mask applied once: the last mask is the strictest
            # (monotone condition), so it zeroes every dropped row.
            h = mask * h

    out_ref[...] = h


def grnn_forward(adj, depth, h0, weights, biases):
    """weights/biases: lists [Wz, Uz, Wr, Ur, Wh, Uh] / [bz, buz, br, bur, bh, buh]."""
    N = adj.shape[0]
    f32 = jnp.float32
    Wz, Uz, Wr, Ur, Wh, Uh = [w.astype(f32) for w in weights]
    bz, buz, br, bur, bh, buh = [v.astype(f32) for v in biases]

    # nn.Linear computes v @ W.T + b, so store transposed, fused weight slabs.
    whx = jnp.concatenate([Wz.T, Wr.T, Wh.T, Uz.T, Ur.T], axis=1)      # (DIM, 5*DIM)
    uh = Uh.T                                                           # (DIM, DIM)
    b = jnp.concatenate([bz + buz, br + bur, bh + buh]).reshape(1, 3 * DIM)

    # Per-iteration activity masks (monotone condition -> no cumulative product),
    # precomputed outside the kernel and lane-broadcast to (N, DIM).
    depth_col = depth.astype(f32).reshape(N, 1)
    masks = [
        jnp.broadcast_to(
            (depth_col + float(i) <= float(ITERATIONS)).astype(f32), (N, DIM))
        for i in range(ITERATIONS)
    ]

    # Packed data buffer: [ adj | h0 * mask_0 ]  -> single input DMA.
    h0m = h0.astype(f32) * masks[0]
    data = jnp.concatenate([adj.astype(f32), h0m], axis=1)              # (N, N + DIM)

    # Packed params buffer: weights, biases and masks -> single input DMA.
    p_rows = R_MASK + ITERATIONS * N
    params = jnp.zeros((p_rows, P_COLS), f32)
    params = params.at[R_WHX:R_WHX + DIM, :].set(whx)
    params = params.at[R_UH:R_UH + DIM, :DIM].set(uh)
    params = params.at[R_B:R_B + 1, :3 * DIM].set(b)
    for i in range(ITERATIONS):
        params = params.at[R_MASK + i * N:R_MASK + (i + 1) * N, :DIM].set(masks[i])

    vmem = pl.BlockSpec(memory_space=pltpu.MemorySpace.VMEM)
    return pl.pallas_call(
        grnn_kernel,
        out_shape=jax.ShapeDtypeStruct((N, DIM), f32),
        in_specs=[vmem, vmem],
        out_specs=vmem,
    )(data, params)


def reference_numpy(adj, depth, h0, weights, biases):
    """Direct dict-based transcription of the PyTorch forward (numpy, float64)."""
    N = adj.shape[0]
    Wz, Uz, Wr, Ur, Wh, Uh = [np.asarray(w, np.float64) for w in weights]
    bz, buz, br, bur, bh, buh = [np.asarray(v, np.float64) for v in biases]

    def sig(v):
        return 1.0 / (1.0 + np.exp(-v))

    h = {u: np.asarray(h0[u], np.float64).copy() for u in range(N)}
    for i in range(ITERATIONS):
        x = {u: np.zeros(DIM) for u in h.keys() if depth[u] + i <= ITERATIONS}
        for u in x.keys():
            for v in range(N):
                if adj[u, v] > 0 and v in x:
                    x[u] = x[u] + h[v]
        h_temp = {}
        for u in x.keys():
            xi, hi = x[u], h[u]
            z = sig(xi @ Wz.T + bz + hi @ Uz.T + buz)
            r = sig(xi @ Wr.T + br + hi @ Ur.T + bur)
            h_temp[u] = z * hi + (1 - z) * np.tanh(xi @ Wh.T + bh + (r * hi) @ Uh.T + buh)
        h = h_temp
    dense = np.zeros((N, DIM))
    for u, v in h.items():
        dense[u] = v
    return dense


if __name__ == "__main__":
    N = 16  # number of graph nodes
    key = jax.random.PRNGKey(0)
    k_adj, k_depth, k_h, k_w, k_b = jax.random.split(key, 5)

    # deterministic symmetric 0/1 adjacency, no self loops
    a = (jax.random.uniform(k_adj, (N, N)) < 0.3).astype(jnp.float32)
    adj = jnp.clip(a + a.T, 0.0, 1.0) * (1.0 - jnp.eye(N, dtype=jnp.float32))

    depth = jax.random.randint(k_depth, (N,), 0, 4).astype(jnp.float32)
    h0 = jax.random.normal(k_h, (N, DIM), dtype=jnp.float32)

    wkeys = jax.random.split(k_w, 6)
    bkeys = jax.random.split(k_b, 6)
    bound = 1.0 / np.sqrt(DIM)
    weights = [jax.random.uniform(k, (DIM, DIM), minval=-bound, maxval=bound) for k in wkeys]
    biases = [jax.random.uniform(k, (DIM,), minval=-bound, maxval=bound) for k in bkeys]

    ref = reference_numpy(
        np.asarray(adj), np.asarray(depth), np.asarray(h0),
        [np.asarray(w) for w in weights], [np.asarray(v) for v in biases],
    )

    out = jax.block_until_ready(grnn_forward(adj, depth, h0, weights, biases))
    np.testing.assert_allclose(np.asarray(out), ref, rtol=1e-4, atol=1e-4)

    print("KERNEL_OK")
</pallas_src>

<mosaic_0001>
module attributes {stable_mosaic.version = 11 : i64} {
  func.func @grnn_kernel(%arg0: memref<16x26xf32, #tpu.memory_space<vmem>>, %arg1: memref<72x50xf32, #tpu.memory_space<vmem>>, %arg2: memref<16x10xf32, #tpu.memory_space<vmem>>) attributes {dimension_semantics = [], scalar_prefetch = 0 : i64, scratch_operands = 0 : i64, tpu.core_type = #tpu.core_type<tc>} {
    %c0 = arith.constant 0 : index
    %c0_0 = arith.constant 0 : index
    %0 = vector.load %arg0[%c0, %c0_0] : memref<16x26xf32, #tpu.memory_space<vmem>>, vector<16x16xf32>
    %c0_1 = arith.constant 0 : index
    %c16 = arith.constant 16 : index
    %1 = vector.load %arg0[%c0_1, %c16] : memref<16x26xf32, #tpu.memory_space<vmem>>, vector<16x10xf32>
    %c0_2 = arith.constant 0 : index
    %c0_3 = arith.constant 0 : index
    %2 = vector.load %arg1[%c0_2, %c0_3] : memref<72x50xf32, #tpu.memory_space<vmem>>, vector<10x50xf32>
    %c16_4 = arith.constant 16 : index
    %c0_5 = arith.constant 0 : index
    %3 = vector.load %arg1[%c16_4, %c0_5] : memref<72x50xf32, #tpu.memory_space<vmem>>, vector<10x10xf32>
    %c32 = arith.constant 32 : index
    %c0_6 = arith.constant 0 : index
    %4 = vector.load %arg1[%c32, %c0_6] : memref<72x50xf32, #tpu.memory_space<vmem>>, vector<1x30xf32>
    %cst = arith.constant dense<0.000000e+00> : vector<16x50xf32>
    %5 = tpu.matmul %1, %2, %cst {dimension_numbers = #tpu.dot_dimension_numbers<[1], [0], [0], [1], [0, 0, 1, 1], [], []>} : vector<16x10xf32>, vector<10x50xf32>, vector<16x50xf32> -> vector<16x50xf32>
    %6 = vector.extract_strided_slice %5 {offsets = [0, 0], sizes = [16, 30], strides = [1, 1]} : vector<16x50xf32> to vector<16x30xf32>
    %cst_7 = arith.constant dense<0.000000e+00> : vector<16x30xf32>
    %7 = tpu.matmul %0, %6, %cst_7 {dimension_numbers = #tpu.dot_dimension_numbers<[1], [0], [0], [1], [0, 0, 1, 1], [], []>} : vector<16x16xf32>, vector<16x30xf32>, vector<16x30xf32> -> vector<16x30xf32>
    %8 = vector.broadcast %4 : vector<1x30xf32> to vector<16x30xf32>
    %9 = arith.addf %7, %8 : vector<16x30xf32>
    %10 = vector.extract_strided_slice %5 {offsets = [0, 30], sizes = [16, 20], strides = [1, 1]} : vector<16x50xf32> to vector<16x20xf32>
    %11 = vector.extract_strided_slice %9 {offsets = [0, 0], sizes = [16, 10], strides = [1, 1]} : vector<16x30xf32> to vector<16x10xf32>
    %12 = vector.extract_strided_slice %10 {offsets = [0, 0], sizes = [16, 10], strides = [1, 1]} : vector<16x20xf32> to vector<16x10xf32>
    %13 = arith.addf %11, %12 : vector<16x10xf32>
    %14 = arith.negf %13 : vector<16x10xf32>
    %15 = math.exp %14 : vector<16x10xf32>
    %cst_8 = arith.constant 1.000000e+00 : f32
    %16 = vector.broadcast %cst_8 : f32 to vector<16x10xf32>
    %17 = arith.addf %16, %15 : vector<16x10xf32>
    %18 = arith.divf %16, %17 : vector<16x10xf32>
    %19 = vector.extract_strided_slice %9 {offsets = [0, 10], sizes = [16, 10], strides = [1, 1]} : vector<16x30xf32> to vector<16x10xf32>
    %20 = vector.extract_strided_slice %10 {offsets = [0, 10], sizes = [16, 10], strides = [1, 1]} : vector<16x20xf32> to vector<16x10xf32>
    %21 = arith.addf %19, %20 : vector<16x10xf32>
    %22 = arith.negf %21 : vector<16x10xf32>
    %23 = math.exp %22 : vector<16x10xf32>
    %cst_9 = arith.constant 1.000000e+00 : f32
    %24 = vector.broadcast %cst_9 : f32 to vector<16x10xf32>
    %25 = arith.addf %24, %23 : vector<16x10xf32>
    %26 = arith.divf %24, %25 : vector<16x10xf32>
    %27 = vector.extract_strided_slice %9 {offsets = [0, 20], sizes = [16, 10], strides = [1, 1]} : vector<16x30xf32> to vector<16x10xf32>
    %28 = arith.mulf %26, %1 : vector<16x10xf32>
    %cst_10 = arith.constant dense<0.000000e+00> : vector<16x10xf32>
    %29 = tpu.matmul %28, %3, %cst_10 {dimension_numbers = #tpu.dot_dimension_numbers<[1], [0], [0], [1], [0, 0, 1, 1], [], []>} : vector<16x10xf32>, vector<10x10xf32>, vector<16x10xf32> -> vector<16x10xf32>
    %30 = arith.addf %27, %29 : vector<16x10xf32>
    %31 = math.tanh %30 : vector<16x10xf32>
    %32 = arith.mulf %18, %1 : vector<16x10xf32>
    %cst_11 = arith.constant 1.000000e+00 : f32
    %33 = vector.broadcast %cst_11 : f32 to vector<16x10xf32>
    %34 = arith.subf %33, %18 : vector<16x10xf32>
    %35 = arith.mulf %34, %31 : vector<16x10xf32>
    %36 = arith.addf %32, %35 : vector<16x10xf32>
    %c56 = arith.constant 56 : index
    %c0_12 = arith.constant 0 : index
    %37 = vector.load %arg1[%c56, %c0_12] : memref<72x50xf32, #tpu.memory_space<vmem>>, vector<16x10xf32>
    %38 = arith.mulf %36, %37 : vector<16x10xf32>
    %cst_13 = arith.constant dense<0.000000e+00> : vector<16x50xf32>
    %39 = tpu.matmul %38, %2, %cst_13 {dimension_numbers = #tpu.dot_dimension_numbers<[1], [0], [0], [1], [0, 0, 1, 1], [], []>} : vector<16x10xf32>, vector<10x50xf32>, vector<16x50xf32> -> vector<16x50xf32>
    %40 = vector.extract_strided_slice %39 {offsets = [0, 0], sizes = [16, 30], strides = [1, 1]} : vector<16x50xf32> to vector<16x30xf32>
    %cst_14 = arith.constant dense<0.000000e+00> : vector<16x30xf32>
    %41 = tpu.matmul %0, %40, %cst_14 {dimension_numbers = #tpu.dot_dimension_numbers<[1], [0], [0], [1], [0, 0, 1, 1], [], []>} : vector<16x16xf32>, vector<16x30xf32>, vector<16x30xf32> -> vector<16x30xf32>
    %42 = vector.broadcast %4 : vector<1x30xf32> to vector<16x30xf32>
    %43 = arith.addf %41, %42 : vector<16x30xf32>
    %44 = vector.extract_strided_slice %39 {offsets = [0, 30], sizes = [16, 20], strides = [1, 1]} : vector<16x50xf32> to vector<16x20xf32>
    %45 = vector.extract_strided_slice %43 {offsets = [0, 0], sizes = [16, 10], strides = [1, 1]} : vector<16x30xf32> to vector<16x10xf32>
    %46 = vector.extract_strided_slice %44 {offsets = [0, 0], sizes = [16, 10], strides = [1, 1]} : vector<16x20xf32> to vector<16x10xf32>
    %47 = arith.addf %45, %46 : vector<16x10xf32>
    %48 = arith.negf %47 : vector<16x10xf32>
    %49 = math.exp %48 : vector<16x10xf32>
    %cst_15 = arith.constant 1.000000e+00 : f32
    %50 = vector.broadcast %cst_15 : f32 to vector<16x10xf32>
    %51 = arith.addf %50, %49 : vector<16x10xf32>
    %52 = arith.divf %50, %51 : vector<16x10xf32>
    %53 = vector.extract_strided_slice %43 {offsets = [0, 10], sizes = [16, 10], strides = [1, 1]} : vector<16x30xf32> to vector<16x10xf32>
    %54 = vector.extract_strided_slice %44 {offsets = [0, 10], sizes = [16, 10], strides = [1, 1]} : vector<16x20xf32> to vector<16x10xf32>
    %55 = arith.addf %53, %54 : vector<16x10xf32>
    %56 = arith.negf %55 : vector<16x10xf32>
    %57 = math.exp %56 : vector<16x10xf32>
    %cst_16 = arith.constant 1.000000e+00 : f32
    %58 = vector.broadcast %cst_16 : f32 to vector<16x10xf32>
    %59 = arith.addf %58, %57 : vector<16x10xf32>
    %60 = arith.divf %58, %59 : vector<16x10xf32>
    %61 = vector.extract_strided_slice %43 {offsets = [0, 20], sizes = [16, 10], strides = [1, 1]} : vector<16x30xf32> to vector<16x10xf32>
    %62 = arith.mulf %60, %38 : vector<16x10xf32>
    %cst_17 = arith.constant dense<0.000000e+00> : vector<16x10xf32>
    %63 = tpu.matmul %62, %3, %cst_17 {dimension_numbers = #tpu.dot_dimension_numbers<[1], [0], [0], [1], [0, 0, 1, 1], [], []>} : vector<16x10xf32>, vector<10x10xf32>, vector<16x10xf32> -> vector<16x10xf32>
    %64 = arith.addf %61, %63 : vector<16x10xf32>
    %65 = math.tanh %64 : vector<16x10xf32>
    %66 = arith.mulf %52, %38 : vector<16x10xf32>
    %cst_18 = arith.constant 1.000000e+00 : f32
    %67 = vector.broadcast %cst_18 : f32 to vector<16x10xf32>
    %68 = arith.subf %67, %52 : vector<16x10xf32>
    %69 = arith.mulf %68, %65 : vector<16x10xf32>
    %70 = arith.addf %66, %69 : vector<16x10xf32>
    %71 = arith.mulf %37, %70 : vector<16x10xf32>
    %c0_19 = arith.constant 0 : index
    %c0_20 = arith.constant 0 : index
    %72 = vector.load %arg2[%c0_19, %c0_20] : memref<16x10xf32, #tpu.memory_space<vmem>>, vector<16x10xf32>
    tpu.vector_store %arg2[%c0_19, %c0_20], %71 {strides = array<i32>} : memref<16x10xf32, #tpu.memory_space<vmem>>, vector<16x10xf32>,
    return
  }
}

</mosaic_0001>

<bundles_post_ra>
// kernel: tpu_custom_call.1
= control target key start
LH: loop header
LB: loop body
LE: loop exit
PB: predicated region body
PF: predicated region fallthrough
CT: control target
= control target key end

     0   :  { %vm30_vm0 = vcmask 1041408   ;;  %s488_s13 = smov 112   ;;  %s630_s0 = inlined_call_operand.vmem [shape: f32[16,26], index: 0, kind: input, shape index: {}]   ;;  %s631_s1 = inlined_call_operand.vmem [shape: f32[72,50], index: 1, kind: input, shape index: {}]   ;;  %s632_s2 = inlined_call_operand.hbm [shape: f32[16,10], index: 2, kind: output, shape index: {}]  }
   0x1   :  { %v516_v0 = vld [vmem:[%s630_s0 + $0x8] sm:$0xff]  ;;  %v14_v2 = vld [vmem:[%s631_s1] sm:$0xff] }
   0x2   :  { %v15_v1 = vld [vmem:[%s631_s1 + $0x8] sm:$0x3]  ;;  %23 = vrot.lane.b32.xlu0 %v516_v0, %s488_s13 }
   0x3   :  { %423 = vmatpush.msk.msra.mxu2 %vm30_vm0, %v15_v1 }
   0x4   :  { %7 = vsyncpa [#allocation3], 0  ;;  %403 = vmatpush.msk.msra.mxu0 %vm30_vm0, %v15_v1  ;;  %v530_v3 = vld [vmem:[%s630_s0] sm:$0xff]  ;;  %vm25_vm1 = vcmask 80896   ;;  %s489_s18 = smov 122   ;;  %vm58_vm2 = vcmask 130048  }
   0x5   :  { %424 = vmatpush.msra.mxu2 %v14_v2  ;;  %134 = vrot.lane.b32.xlu2 %v530_v3, %s489_s18  ;;  %s490_s0 = smov 98   ;;  %v553_v8 = vld [vmem:[%s631_s1 + $0x20] ss:$0 sm:$0xff]  ;;  %v17_v18 = vld [vmem:[%s631_s1 + $0x18] sm:$0x3]  ;;  %v16_v19 = vld [vmem:[%s631_s1 + $0x10] sm:$0xff] }
   0x6   :  { %49 = vmatpush.msra.mxu0 %v14_v2  ;;  %s491_s25 = smov 118   ;;  %s492_s26 = smov 20   ;;  %v585_v63 = vld [vmem:[%s631_s1 + $0x38] sm:$0xff] }
   0x7   :  { %410 = vmatpush.msk.msrb.mxu2 %vm30_vm0, %v17_v18  ;;  %s493_s27 = smov 108   ;;  %s494_s30 = smov 10  }
   0x8   :  { %s391_s8 = sshll.u32 %s632_s2, 4  ;;  %s496_s9 = smov 128   ;;  %s392_s8 = int_to_ptr.hbm [resolvable:$true] %s391_s8 }
   0x9   :  { %170 = vmatpush.msrb.mxu2 %v16_v19  ;;  %s497_s10 = smov 8  }
   0xa   :  { %21 = vrot.lane.b32.xlu0 %v530_v3, %s488_s13 }
   0xd   :  { %136 = vrot.lane.b32.xlu2 %v516_v0, %s489_s18 }
  0x5f   :  { %v135_v29 = vpop.permute.xlu2 %134 }
  0x67   :  { %v137_v44 = vpop.permute.xlu2 %136 }
  0x74   :  { %v533_v4 = vpop.permute.xlu0 %23 }
  0x75   :  { %405 = vmatmul.msk.f32.vlgmr.msra.gmra.mxu2 %vm25_vm1, %v533_v4 }
  0x7c   :  { %v537_v5 = vpop.permute.xlu0 %21 }
  0x7d   :  { %404 = vmatmul.msk.f32.vlgmr.msra.gmra.mxu0 %vm25_vm1, %v537_v5 }
  0xf8   :  { %v54_v6 = vpop.f32.mrf.mxu2 }
  0xf9   :  { %77 = vmatpush.msra.mxu1 %v54_v6  ;;  %425 = vmatpush.msra.mxu3 %v54_v6 }
  0xfa   :  { %v51_v7 = vpop.f32.mrf.mxu0 }
  0xfb   :  { %88 = vrot.lane.b32.xlu1 %v51_v7, %s490_s0  ;;  %78 = vmatpush.msra.mxu1 %v51_v7 }
  0xfc   :  { %426 = vmatpush.msra.mxu3 %v51_v7  ;;  %406 = vmatmul.msk.f32.vlgmr.msra.gmra.mxu1 %vm58_vm2, %v530_v3 }
  0xfd   :  { %407 = vmatmul.msk.f32.vlgmr.msra.gmra.mxu3 %vm58_vm2, %v516_v0  ;;  %420 = vmatpush.msk.msrb.mxu1 %vm30_vm0, %v17_v18 }
  0xfe   :  { %413 = vmatpush.msk.msrb.mxu3 %vm30_vm0, %v15_v1 }
  0xff   :  { %345 = vmatpush.msrb.mxu1 %v16_v19 }
 0x100   :  { %233 = vmatpush.msrb.mxu3 %v14_v2 }
 0x103   :  { %90 = vrot.lane.b32.xlu1 %v54_v6, %s490_s0 }
 0x16d   :  { %v89_v9 = vpop.permute.xlu1 %88 }
 0x175   :  { %v91_v16 = vpop.permute.xlu1 %90 }
 0x179   :  { %v80_v10 = vpop.f32.mrf.mxu1 }
 0x17a   :  { %v556_v11 = vadd.f32 %v553_v8, %v80_v10  ;;  %v597_v10 = vld [vmem:[%s631_s1 + $0x40] sm:$0xff]  ;;  %s495_s1 = smov [#allocation2]  }
 0x17b   :  { %s389_s5 = sshll.u32 %s495_s1, 4  ;;  %s390_s5 = int_to_ptr.vmem [resolvable:$true] %s389_s5 }
 0x17c   :  { %v94_v12 = vadd.f32 %v89_v9, %v556_v11 }
 0x17e   :  { %v408_v13 = vmul.f32 -1.442695, %v94_v12 }
 0x180   :  { %438 = vpow2.f32 %v408_v13  ;;  %v83_v14 = vpop.f32.mrf.mxu3 }
 0x181   :  { %v560_v15 = vadd.f32 %v553_v8, %v83_v14 }
 0x183   :  { %v95_v17 = vadd.f32 %v91_v16, %v560_v15 }
 0x185   :  { %v409_v20 = vmul.f32 -1.442695, %v95_v17 }
 0x186   :  { %v439_v21 = vpop.eup %438 }
 0x187   :  { %v102_v22 = vadd.f32 1.0, %v439_v21  ;;  %440 = vpow2.f32 %v409_v20 }
 0x189   :  { %442 = vrcp.f32 %v102_v22  ;;  %v115_v28 = vand.u32 2147483648, %v102_v22  ;;  %v113_v31 = vand.u32 2147483647, %v102_v22  ;;  %vm109_vm4 = vweird.f32 %v102_v22 }
 0x18b   :  { %v116_v34 = vor.u32 1.1754944e-38, %v115_v28  ;;  %vm114_vm6 = vcmp.eq.f32.partialorder %v113_v31, 8.507059e+37 }
 0x18d   :  { %v441_v23 = vpop.eup %440 }
 0x18e   :  { %v103_v24 = vadd.f32 1.0, %v441_v23 }
 0x18f   :  { %v443_v25 = vpop.eup %442 }
 0x190   :  { %444 = vrcp.f32 %v103_v24  ;;  %v105_v26 = vmul.f32 %v443_v25, %v102_v22  ;;  %vm110_vm3 = vweird.f32 %v443_v25  ;;  %v130_v40 = vand.u32 2147483648, %v103_v24 }
 0x191   :  { %vm111_vm5 = vmor %vm109_vm4, %vm110_vm3  ;;  %v128_v42 = vand.u32 2147483647, %v103_v24  ;;  %vm124_vm8 = vweird.f32 %v103_v24 }
 0x192   :  { %v106_v27 = vsub.f32 1.0, %v105_v26  ;;  %v131_v45 = vor.u32 1.1754944e-38, %v130_v40 }
 0x193   :  { %vm129_vm10 = vcmp.eq.f32.partialorder %v128_v42, 8.507059e+37 }
 0x194   :  { %v107_v30 = vmul.f32 %v443_v25, %v106_v27 }
 0x196   :  { %v445_v32 = vpop.eup %444  ;;  %v108_v33 = vadd.f32 %v443_v25, %v107_v30 }
 0x197   :  { %v120_v35 = vmul.f32 %v445_v32, %v103_v24  ;;  %vm125_vm7 = vweird.f32 %v445_v32 }
 0x198   :  { %v112_v36 = vsel %vm111_vm5, %v443_v25, %v108_v33  ;;  %vm126_vm9 = vmor %vm124_vm8, %vm125_vm7 }
 0x199   :  { %v117_v37 = vsel %vm114_vm6, %v116_v34, %v112_v36  ;;  %v121_v38 = vsub.f32 1.0, %v120_v35 }
 0x19a   :  { %v140_v39 = vmul.f32 %v135_v29, %v117_v37  ;;  %v194_v59 = vsub.f32 1.0, %v117_v37  ;;  %v192_v61 = vmul.f32 %v117_v37, %v537_v5 }
 0x19b   :  { %v122_v41 = vmul.f32 %v445_v32, %v121_v38 }
 0x19c   :  { %144 = vrot.lane.b32.xlu0 %v140_v39, %s491_s25 }
 0x19d   :  { %v123_v43 = vadd.f32 %v445_v32, %v122_v41 }
 0x19f   :  { %v127_v46 = vsel %vm126_vm9, %v445_v32, %v123_v43 }
 0x1a0   :  { %v132_v47 = vsel %vm129_vm10, %v131_v45, %v127_v46 }
 0x1a1   :  { %v141_v48 = vmul.f32 %v137_v44, %v132_v47  ;;  %v195_v6 = vsub.f32 1.0, %v132_v47  ;;  %v193_v5 = vmul.f32 %v132_v47, %v533_v4 }
 0x1a3   :  { %146 = vrot.lane.b32.xlu1 %v141_v48, %s491_s25 }
 0x20e   :  { %v145_v49 = vpop.permute.xlu0 %144 }
 0x20f   :  { %411 = vmatmul.msk.f32.vlgmr.msrb.gmra.mxu2 %vm25_vm1, %v145_v49 }
 0x215   :  { %v147_v50 = vpop.permute.xlu1 %146 }
 0x217   :  { %412 = vmatmul.msk.f32.gmra.mxu2 %vm25_vm1, %v147_v50 }
 0x292   :  { %v172_v51 = vpop.f32.mrf.mxu2 }
 0x293   :  { %180 = vrot.lane.b32.xlu2 %v172_v51, %s492_s26 }
 0x29a   :  { %v175_v52 = vpop.f32.mrf.mxu2 }
 0x29b   :  { %182 = vrot.lane.b32.xlu0 %v175_v52, %s492_s26 }
 0x2ed   :  { %v181_v53 = vpop.permute.xlu2 %180 }
 0x2ee   :  { %v186_v54 = vadd.f32 %v181_v53, %v556_v11 }
 0x2f0   :  { %446 = vtanh.f32 %v186_v54 }
 0x2f6   :  { %v447_v55 = vpop.eup %446 }
 0x2f7   :  { %198 = vrot.lane.b32.xlu1 %v447_v55, %s493_s27 }
 0x30d   :  { %v183_v56 = vpop.permute.xlu0 %182 }
 0x30e   :  { %v187_v57 = vadd.f32 %v183_v56, %v560_v15 }
 0x310   :  { %448 = vtanh.f32 %v187_v57 }
 0x316   :  { %v449_v58 = vpop.eup %448 }
 0x317   :  { %200 = vrot.lane.b32.xlu2 %v449_v58, %s493_s27 }
 0x369   :  { %v199_v60 = vpop.permute.xlu1 %198 }
 0x36a   :  { %v204_v62 = vmul.f32 %v199_v60, %v194_v59 }
 0x36c   :  { %v206_v1 = vadd.f32 %v204_v62, %v192_v61 }
 0x36e   :  { %v588_v2 = vmul.f32 %v585_v63, %v206_v1 }
 0x370   :  { %414 = vmatmul.msk.f32.vlgmr.msrb.gmra.mxu3 %vm25_vm1, %v588_v2  ;;  %312 = vrot.lane.b32.xlu2 %v588_v2, %s494_s30 }
 0x371   :  { %v201_v7 = vpop.permute.xlu2 %200 }
 0x372   :  { %v205_v9 = vmul.f32 %v201_v7, %v195_v6 }
 0x374   :  { %v207_v11 = vadd.f32 %v205_v9, %v193_v5 }
 0x376   :  { %v600_v12 = vmul.f32 %v597_v10, %v207_v11 }
 0x378   :  { %415 = vmatmul.msk.f32.gmra.mxu3 %vm25_vm1, %v600_v12 }
 0x3ca   :  { %v313_v36 = vpop.permute.xlu2 %312 }
 0x3f3   :  { %v235_v13 = vpop.f32.mrf.mxu3 }
 0x3f4   :  { %266 = vrot.lane.b32.xlu0 %v235_v13, %s490_s0 }
 0x3fb   :  { %v238_v14 = vpop.f32.mrf.mxu3 }
 0x3fc   :  { %314 = vrot.lane.b32.xlu0 %v600_v12, %s494_s30  ;;  %268 = vrot.lane.b32.xlu1 %v238_v14, %s490_s0 }
 0x3fd   :  { %255 = vmatpush.msrb.mxu0 %v238_v14 }
 0x3ff   :  { %256 = vmatpush.msrb.mxu0 %v235_v13 }
 0x400   :  { %416 = vmatmul.msk.f32.vlgmr.msrb.gmra.mxu0 %vm58_vm2, %v530_v3 }
 0x408   :  { %417 = vmatmul.msk.f32.gmra.mxu0 %vm58_vm2, %v516_v0 }
 0x466   :  { %v267_v16 = vpop.permute.xlu0 %266 }
 0x46e   :  { %v269_v21 = vpop.permute.xlu1 %268  ;;  %v315_v46 = vpop.permute.xlu0 %314 }
 0x47d   :  { %v258_v4 = vpop.f32.mrf.mxu0 }
 0x47e   :  { %v259_v15 = vadd.f32 %v553_v8, %v258_v4 }
 0x480   :  { %v272_v17 = vadd.f32 %v267_v16, %v259_v15 }
 0x482   :  { %v418_v18 = vmul.f32 -1.442695, %v272_v17 }
 0x484   :  { %450 = vpow2.f32 %v418_v18 }
 0x485   :  { %v261_v19 = vpop.f32.mrf.mxu0 }
 0x486   :  { %v262_v20 = vadd.f32 %v553_v8, %v261_v19 }
 0x488   :  { %v273_v22 = vadd.f32 %v269_v21, %v262_v20 }
 0x48a   :  { %v451_v23 = vpop.eup %450  ;;  %v419_v24 = vmul.f32 -1.442695, %v273_v22 }
 0x48b   :  { %v280_v25 = vadd.f32 1.0, %v451_v23 }
 0x48c   :  { %452 = vpow2.f32 %v419_v24 }
 0x48d   :  { %454 = vrcp.f32 %v280_v25  ;;  %v293_v29 = vand.u32 2147483648, %v280_v25  ;;  %v291_v31 = vand.u32 2147483647, %v280_v25  ;;  %vm287_vm12 = vweird.f32 %v280_v25 }
 0x48f   :  { %v294_v33 = vor.u32 1.1754944e-38, %v293_v29  ;;  %vm292_vm14 = vcmp.eq.f32.partialorder %v291_v31, 8.507059e+37 }
 0x492   :  { %v453_v3 = vpop.eup %452 }
 0x493   :  { %v455_v26 = vpop.eup %454  ;;  %v281_v0 = vadd.f32 1.0, %v453_v3 }
 0x494   :  { %v283_v27 = vmul.f32 %v455_v26, %v280_v25  ;;  %vm288_vm11 = vweird.f32 %v455_v26 }
 0x495   :  { %456 = vrcp.f32 %v281_v0  ;;  %vm289_vm13 = vmor %vm287_vm12, %vm288_vm11  ;;  %v308_v40 = vand.u32 2147483648, %v281_v0  ;;  %v306_v42 = vand.u32 2147483647, %v281_v0  ;;  %vm302_vm0 = vweird.f32 %v281_v0 }
 0x496   :  { %v284_v28 = vsub.f32 1.0, %v283_v27 }
 0x497   :  { %v309_v44 = vor.u32 1.1754944e-38, %v308_v40  ;;  %vm307_vm3 = vcmp.eq.f32.partialorder %v306_v42, 8.507059e+37 }
 0x498   :  { %v285_v30 = vmul.f32 %v455_v26, %v284_v28 }
 0x49a   :  { %v286_v32 = vadd.f32 %v455_v26, %v285_v30 }
 0x49b   :  { %v457_v8 = vpop.eup %456 }
 0x49c   :  { %v290_v34 = vsel %vm289_vm13, %v455_v26, %v286_v32  ;;  %v298_v35 = vmul.f32 %v457_v8, %v281_v0  ;;  %vm303_vm15 = vweird.f32 %v457_v8 }
 0x49d   :  { %v295_v37 = vsel %vm292_vm14, %v294_v33, %v290_v34  ;;  %vm304_vm2 = vmor %vm302_vm0, %vm303_vm15 }
 0x49e   :  { %v318_v38 = vmul.f32 %v313_v36, %v295_v37  ;;  %v299_v39 = vsub.f32 1.0, %v298_v35  ;;  %v367_v59 = vsub.f32 1.0, %v295_v37  ;;  %v365_v61 = vmul.f32 %v295_v37, %v588_v2 }
 0x4a0   :  { %322 = vrot.lane.b32.xlu1 %v318_v38, %s491_s25  ;;  %v300_v41 = vmul.f32 %v457_v8, %v299_v39 }
 0x4a2   :  { %v301_v43 = vadd.f32 %v457_v8, %v300_v41 }
 0x4a4   :  { %v305_v45 = vsel %vm304_vm2, %v457_v8, %v301_v43 }
 0x4a5   :  { %v310_v47 = vsel %vm307_vm3, %v309_v44, %v305_v45 }
 0x4a6   :  { %v319_v48 = vmul.f32 %v315_v46, %v310_v47  ;;  %v368_v7 = vsub.f32 1.0, %v310_v47  ;;  %v366_v9 = vmul.f32 %v310_v47, %v600_v12 }
 0x4a8   :  { %324 = vrot.lane.b32.xlu2 %v319_v48, %s491_s25 }
 0x502   :  { %v325_v50 = vpop.permute.xlu2 %324 }
 0x512   :  { %v323_v49 = vpop.permute.xlu1 %322 }
 0x513   :  { %421 = vmatmul.msk.f32.vlgmr.msrb.gmra.mxu1 %vm25_vm1, %v323_v49 }
 0x51b   :  { %422 = vmatmul.msk.f32.gmra.mxu1 %vm25_vm1, %v325_v50 }
 0x590   :  { %v347_v51 = vpop.f32.mrf.mxu1 }
 0x591   :  { %355 = vrot.lane.b32.xlu0 %v347_v51, %s492_s26 }
 0x598   :  { %v350_v52 = vpop.f32.mrf.mxu1 }
 0x599   :  { %357 = vrot.lane.b32.xlu1 %v350_v52, %s492_s26 }
 0x603   :  { %v356_v53 = vpop.permute.xlu0 %355 }
 0x604   :  { %v361_v54 = vadd.f32 %v356_v53, %v259_v15 }
 0x606   :  { %458 = vtanh.f32 %v361_v54 }
 0x60b   :  { %v358_v55 = vpop.permute.xlu1 %357 }
 0x60c   :  { %v459_v56 = vpop.eup %458  ;;  %v362_v57 = vadd.f32 %v358_v55, %v262_v20 }
 0x60d   :  { %371 = vrot.lane.b32.xlu2 %v459_v56, %s493_s27 }
 0x60e   :  { %460 = vtanh.f32 %v362_v57 }
 0x614   :  { %v461_v58 = vpop.eup %460 }
 0x615   :  { %373 = vrot.lane.b32.xlu0 %v461_v58, %s493_s27 }
 0x667   :  { %v372_v60 = vpop.permute.xlu2 %371 }
 0x668   :  { %v377_v62 = vmul.f32 %v372_v60, %v367_v59 }
 0x66a   :  { %v379_v1 = vadd.f32 %v377_v62, %v365_v61 }
 0x66c   :  { %v381_v6 = vmul.f32 %v379_v1, %v585_v63 }
 0x66e   :  { %383 = vst.msk [vmem:[#allocation2] sm:$0xff] %vm25_vm1, %v381_v6 }
 0x687   :  { %v374_v5 = vpop.permute.xlu0 %373 }
 0x688   :  { %v378_v11 = vmul.f32 %v374_v5, %v368_v7 }
 0x68a   :  { %v380_v13 = vadd.f32 %v378_v11, %v366_v9 }
 0x68c   :  { %v382_v2 = vmul.f32 %v380_v13, %v597_v10 }
 0x68e   :  { %384 = vst.msk [vmem:[#allocation2 + $0x8] sm:$0xff] %vm25_vm1, %v382_v2 }
 0x68f   :  { %397 = dma.vmem_to_hbm [thread:$0]  %s390_s5, 256, %s392_s8, [#allocation3], %s496_s9, %s496_s9, %s497_s10  }
 0x690   :  { %486 = dma.done.wait [#allocation3], 256  }
 0x691   :  { %487 = vsyncadd [#allocation3], 4294967040 }
 0x692   :  { %402 = vsyncpa [#allocation3], 1 }

</bundles_post_ra>
